<compile_context>
chip_gen: v7x
topology: tpu7x:2x2x1
jax: 0.10.0
libtpu: 0.0.40
codegen_flags: <defaults>
</compile_context>

<pallas_src>
import jax
import jax.numpy as jnp
from jax.experimental import pallas as pl
from jax.experimental.pallas import tpu as pltpu


def decoder_kernel(x_ref, h_ref, enc_ref,
                   w_ih_ref, w_hh_ref, b_ih_ref, b_hh_ref,
                   w_cat_ref, b_cat_ref,
                   w_out_ref, b_out_ref,
                   out_ref, hid_ref, attn_ref,
                   cat_sc):
    # ---- step-invariant part: GRU + attention + concat, computed once ----
    @pl.when(pl.program_id(0) == 0)
    def _():
        x = x_ref[...]                        # (B, H) bf16 embedded input token
        h = h_ref[...]                        # (B, H) f32 previous hidden state
        hb = h.astype(jnp.bfloat16)

        # GRU cell, PyTorch gate order (r, z, n); per-gate (H, H) weights so no
        # lane-axis slicing of a fused (B, 3H) activation is ever needed.
        def gates(g):
            gi = jnp.dot(x, w_ih_ref[g], preferred_element_type=jnp.float32) + b_ih_ref[g]
            gh = jnp.dot(hb, w_hh_ref[g], preferred_element_type=jnp.float32) + b_hh_ref[g]
            return gi, gh

        i_r, h_r = gates(0)
        i_z, h_z = gates(1)
        i_n, h_n = gates(2)
        r = jax.nn.sigmoid(i_r + h_r)
        z = jax.nn.sigmoid(i_z + h_z)
        n = jnp.tanh(i_n + r * h_n)
        h_new = (1.0 - z) * n + z * h         # (B, H) f32 == rnn_output == new hidden
        hid_ref[...] = h_new

        # Luong 'dot' attention on VPU/XLU (M=1 matmuls would waste the MXU and
        # lengthen the step-0 critical path the pipeline must hide).
        enc = enc_ref[...].astype(jnp.float32)                       # (B, L, H)
        energies = jnp.sum(h_new[:, None, :] * enc, axis=-1)         # (B, L)
        m = jnp.max(energies, axis=-1, keepdims=True)
        e = jnp.exp(energies - m)
        attn = e / jnp.sum(e, axis=-1, keepdims=True)                 # exact softmax over L
        attn_ref[...] = attn

        context = jnp.sum(attn[:, :, None] * enc, axis=1)             # (B, H)

        # concat layer without a lane-axis concatenate: two MXU dots summed
        cat = jnp.tanh(
            jnp.dot(h_new.astype(jnp.bfloat16), w_cat_ref[0],
                    preferred_element_type=jnp.float32)
            + jnp.dot(context.astype(jnp.bfloat16), w_cat_ref[1],
                      preferred_element_type=jnp.float32)
            + b_cat_ref[...])
        cat_sc[...] = cat.astype(cat_sc.dtype)    # bf16 feed for the vocab projection

    # ---- per-tile vocab projection: (B, H) x (H, TV) on the MXU, f32 accumulate ----
    out_ref[...] = (
        jnp.dot(cat_sc[...], w_out_ref[...], preferred_element_type=jnp.float32)
        + b_out_ref[...])


def _round_up(x, m):
    return ((x + m - 1) // m) * m


def luong_decoder_forward(input_seq, last_hidden, encoder_outputs, params):
    H = params["embedding"].shape[1]
    V = params["w_out"].shape[0]

    # --- JAX glue: embedding gather + one-time layout plumbing ---
    embedded = params["embedding"][input_seq].astype(jnp.bfloat16)            # (B, H)
    h0 = last_hidden[0].astype(jnp.float32)                                   # (B, H)
    enc_blh = jnp.transpose(encoder_outputs, (1, 0, 2)).astype(jnp.bfloat16)  # (B, L, H)
    B, L, _ = enc_blh.shape

    # Vocab tiling: big lane-dense tiles (<=4096 wide), V padded to a tile multiple.
    TV = min(4096, _round_up(V, 128))
    V_pad = _round_up(V, TV)
    nv = V_pad // TV
    n_buf = 3 if nv >= 3 else 2   # deeper pipeline only pays off with >2 tiles

    # --- Pre-transpose / pre-split weights (no in-kernel .T / concat / lane slice) ---
    w_ih = params["w_ih"]
    w_hh = params["w_hh"]
    w_ih_g = jnp.stack([w_ih[g * H:(g + 1) * H, :].T for g in range(3)]
                       ).astype(jnp.bfloat16)                                  # (3, H, H)
    w_hh_g = jnp.stack([w_hh[g * H:(g + 1) * H, :].T for g in range(3)]
                       ).astype(jnp.bfloat16)                                  # (3, H, H)
    b_ih_g = params["b_ih"].reshape(3, 1, H).astype(jnp.float32)               # (3, 1, H)
    b_hh_g = params["b_hh"].reshape(3, 1, H).astype(jnp.float32)               # (3, 1, H)

    w_cat = jnp.stack([params["w_concat"][:, :H].T,                            # acts on rnn_output
                       params["w_concat"][:, H:].T]                            # acts on context
                      ).astype(jnp.bfloat16)                                   # (2, H, H)
    b_cat = params["b_concat"][None, :].astype(jnp.float32)                    # (1, H)

    w_out_t = jnp.pad(params["w_out"].T.astype(jnp.bfloat16),
                      ((0, 0), (0, V_pad - V)))                                # (H, V_pad) bf16
    b_out = jnp.pad(params["b_out"].astype(jnp.float32)[None, :],
                    ((0, 0), (0, V_pad - V)))                                  # (1, V_pad)

    def fixed(shape):
        nd = len(shape)
        return pl.BlockSpec(shape, lambda j, nd=nd: (0,) * nd)

    in_specs = [
        fixed((B, H)),                               # embedded x (bf16)
        fixed((B, H)),                               # h0 (f32)
        fixed((B, L, H)),                            # encoder outputs (bf16)
        fixed((3, H, H)),                            # w_ih^T per gate (bf16)
        fixed((3, H, H)),                            # w_hh^T per gate (bf16)
        fixed((3, 1, H)),                            # b_ih per gate
        fixed((3, 1, H)),                            # b_hh per gate
        fixed((2, H, H)),                            # w_concat halves^T (bf16)
        fixed((1, H)),                               # b_concat
        pl.BlockSpec((H, TV), lambda j: (0, j),      # w_out^T tiles, 3-deep pipeline
                     pipeline_mode=pl.Buffered(n_buf)),
        pl.BlockSpec((1, TV), lambda j: (0, j),      # b_out tiles
                     pipeline_mode=pl.Buffered(n_buf)),
    ]
    out_specs = (
        pl.BlockSpec((B, TV), lambda j: (0, j)),     # logits tile (lane-dense)
        fixed((B, H)),                               # new hidden (written at j == 0)
        fixed((B, L)),                               # attention weights (written at j == 0)
    )
    out_shapes = (
        jax.ShapeDtypeStruct((B, V_pad), jnp.float32),
        jax.ShapeDtypeStruct((B, H), jnp.float32),
        jax.ShapeDtypeStruct((B, L), jnp.float32),
    )

    # --- VMEM budget (double-buffered fixed blocks + n_buf streamed w_out tiles) ---
    fixed_bytes = (B * H * 2 + B * H * 4 + B * L * H * 2            # x, h0, enc
                   + 2 * 3 * H * H * 2 + 2 * 3 * H * 4              # GRU weights + biases
                   + 2 * H * H * 2 + H * 4                          # concat weights + bias
                   + B * H * 4 + B * L * 4 + B * H * 2)             # hid/attn outputs + scratch
    stream_bytes = n_buf * (H * TV * 2 + TV * 4) + 2 * (B * TV * 4)
    vmem_limit = int(min(max(2 * fixed_bytes + stream_bytes + (8 << 20), 32 << 20), 64 << 20))

    cost = pl.CostEstimate(
        flops=int(2 * B * H * V_pad + 16 * B * H * H + 4 * B * L * H),
        transcendentals=int(B * (3 * H + L)),
        bytes_accessed=int(H * V_pad * 2 + V_pad * 4 + B * V_pad * 4
                           + 8 * H * H * 2 + B * L * H * 2 + B * H * 10),
    )

    logits_pad, h_new, attn = pl.pallas_call(
        decoder_kernel,
        out_shape=out_shapes,
        grid_spec=pltpu.PrefetchScalarGridSpec(
            num_scalar_prefetch=0,
            grid=(nv,),
            in_specs=in_specs,
            out_specs=out_specs,
            scratch_shapes=[pltpu.VMEM((B, H), jnp.bfloat16)],   # cat_out, reused by all tiles
        ),
        # The vocab axis reuses scratch written at program_id == 0, so it must run
        # sequentially on one core ("arbitrary"); weight-tile DMAs are still
        # multi-buffered behind the MXU by the BlockSpec pipeline.
        compiler_params=pltpu.CompilerParams(
            dimension_semantics=("arbitrary",),
            vmem_limit_bytes=vmem_limit,
        ),
        cost_estimate=cost,
    )(
        embedded, h0, enc_blh,
        w_ih_g, w_hh_g, b_ih_g, b_hh_g,
        w_cat, b_cat,
        w_out_t, b_out,
    )

    logits = logits_pad[:, :V]   # drop vocab padding outside the kernel

    # PyTorch return shapes: output (B, V) raw logits, hidden (n_layers, B, H), attn (B, 1, L)
    return logits, h_new[None, :, :], attn[:, None, :]


def init_params(key, hidden_size, output_size):
    ks = jax.random.split(key, 10)
    s = 1.0 / jnp.sqrt(hidden_size)
    u = lambda k, shape: jax.random.uniform(k, shape, jnp.float32, -s, s)
    return {
        "embedding": jax.random.normal(ks[0], (output_size, hidden_size), jnp.float32),
        "w_ih":      u(ks[1], (3 * hidden_size, hidden_size)),
        "w_hh":      u(ks[2], (3 * hidden_size, hidden_size)),
        "b_ih":      u(ks[3], (3 * hidden_size,)),
        "b_hh":      u(ks[4], (3 * hidden_size,)),
        "w_concat":  u(ks[5], (hidden_size, 2 * hidden_size)),
        "b_concat":  u(ks[6], (hidden_size,)),
        "w_out":     u(ks[7], (output_size, hidden_size)),
        "b_out":     u(ks[8], (output_size,)),
    }


if __name__ == "__main__":
    B, H, L, V = 2, 32, 8, 64

    key = jax.random.PRNGKey(0)
    k_par, k_in, k_hid, k_enc = jax.random.split(key, 4)

    params = init_params(k_par, H, V)
    input_seq = jax.random.randint(k_in, (B,), 0, V, dtype=jnp.int32)
    last_hidden = jax.random.normal(k_hid, (1, B, H), jnp.float32)
    encoder_outputs = jax.random.normal(k_enc, (L, B, H), jnp.float32)

    output, hidden, attn_weights = jax.jit(luong_decoder_forward)(
        input_seq, last_hidden, encoder_outputs, params)
    jax.block_until_ready((output, hidden, attn_weights))

    assert output.shape == (B, V)
    assert hidden.shape == (1, B, H)
    assert attn_weights.shape == (B, 1, L)
    print("KERNEL_OK")
</pallas_src>

<mosaic_0001>
module attributes {stable_mosaic.version = 11 : i64} {
  func.func @decoder_kernel(%arg0: i32, %arg1: memref<2x32xbf16, #tpu.memory_space<vmem>>, %arg2: memref<2x32xf32, #tpu.memory_space<vmem>>, %arg3: memref<2x8x32xbf16, #tpu.memory_space<vmem>>, %arg4: memref<3x32x32xbf16, #tpu.memory_space<vmem>>, %arg5: memref<3x32x32xbf16, #tpu.memory_space<vmem>>, %arg6: memref<3x1x32xf32, #tpu.memory_space<vmem>>, %arg7: memref<3x1x32xf32, #tpu.memory_space<vmem>>, %arg8: memref<2x32x32xbf16, #tpu.memory_space<vmem>>, %arg9: memref<1x32xf32, #tpu.memory_space<vmem>>, %arg10: memref<32x128xbf16, #tpu.memory_space<vmem>>, %arg11: memref<1x128xf32, #tpu.memory_space<vmem>>, %arg12: memref<2x128xf32, #tpu.memory_space<vmem>>, %arg13: memref<2x32xf32, #tpu.memory_space<vmem>>, %arg14: memref<2x8xf32, #tpu.memory_space<vmem>>, %arg15: memref<2x32xbf16, #tpu.memory_space<vmem>>) attributes {dimension_semantics = [#tpu.dimension_semantics<arbitrary>], iteration_bounds = array<i64: 1>, scalar_prefetch = 0 : i64, scratch_operands = 1 : i64, tpu.core_type = #tpu.core_type<tc>, window_params = [{pipeline_mode = #tpu.pipeline_mode<synchronous>, transform_indices = @transform_0, window_bounds = array<i64: 2, 32>}, {pipeline_mode = #tpu.pipeline_mode<synchronous>, transform_indices = @transform_1, window_bounds = array<i64: 2, 32>}, {pipeline_mode = #tpu.pipeline_mode<synchronous>, transform_indices = @transform_2, window_bounds = array<i64: 2, 8, 32>}, {pipeline_mode = #tpu.pipeline_mode<synchronous>, transform_indices = @transform_3, window_bounds = array<i64: 3, 32, 32>}, {pipeline_mode = #tpu.pipeline_mode<synchronous>, transform_indices = @transform_4, window_bounds = array<i64: 3, 32, 32>}, {pipeline_mode = #tpu.pipeline_mode<synchronous>, transform_indices = @transform_5, window_bounds = array<i64: 3, 1, 32>}, {pipeline_mode = #tpu.pipeline_mode<synchronous>, transform_indices = @transform_6, window_bounds = array<i64: 3, 1, 32>}, {pipeline_mode = #tpu.pipeline_mode<synchronous>, transform_indices = @transform_7, window_bounds = array<i64: 2, 32, 32>}, {pipeline_mode = #tpu.pipeline_mode<synchronous>, transform_indices = @transform_8, window_bounds = array<i64: 1, 32>}, {pipeline_mode = #tpu.pipeline_mode<double_buffered>, transform_indices = @transform_9, window_bounds = array<i64: 32, 128>}, {pipeline_mode = #tpu.pipeline_mode<double_buffered>, transform_indices = @transform_10, window_bounds = array<i64: 1, 128>}, {transform_indices = @transform_11, window_bounds = array<i64: 2, 128>}, {pipeline_mode = #tpu.pipeline_mode<synchronous>, transform_indices = @transform_12, window_bounds = array<i64: 2, 32>}, {pipeline_mode = #tpu.pipeline_mode<synchronous>, transform_indices = @transform_13, window_bounds = array<i64: 2, 8>}]} {
    %c0_i32 = arith.constant 0 : i32
    %0 = arith.cmpi eq, %arg0, %c0_i32 : i32
    %1 = arith.extui %0 : i1 to i32
    %c0_i32_0 = arith.constant 0 : i32
    %2 = arith.cmpi ne, %1, %c0_i32_0 : i32
    scf.if %2 {
      %c0_8 = arith.constant 0 : index
      %c0_9 = arith.constant 0 : index
      %10 = vector.load %arg1[%c0_8, %c0_9] : memref<2x32xbf16, #tpu.memory_space<vmem>>, vector<2x32xbf16>
      %c0_10 = arith.constant 0 : index
      %c0_11 = arith.constant 0 : index
      %11 = vector.load %arg2[%c0_10, %c0_11] : memref<2x32xf32, #tpu.memory_space<vmem>>, vector<2x32xf32>
      %12 = arith.truncf %11 : vector<2x32xf32> to vector<2x32xbf16>
      %c0_12 = arith.constant 0 : index
      %c0_13 = arith.constant 0 : index
      %c0_14 = arith.constant 0 : index
      %13 = vector.load %arg4[%c0_12, %c0_13, %c0_14] : memref<3x32x32xbf16, #tpu.memory_space<vmem>>, vector<1x32x32xbf16>
      %14 = vector.shape_cast %13 : vector<1x32x32xbf16> to vector<32x32xbf16>
      %cst_15 = arith.constant dense<0.000000e+00> : vector<2x32xf32>
      %15 = tpu.matmul %10, %14, %cst_15 {dimension_numbers = #tpu.dot_dimension_numbers<[1], [0], [0], [1], [0, 0, 1, 1], [], []>} : vector<2x32xbf16>, vector<32x32xbf16>, vector<2x32xf32> -> vector<2x32xf32>
      %c0_16 = arith.constant 0 : index
      %c0_17 = arith.constant 0 : index
      %c0_18 = arith.constant 0 : index
      %16 = vector.load %arg6[%c0_16, %c0_17, %c0_18] : memref<3x1x32xf32, #tpu.memory_space<vmem>>, vector<1x1x32xf32>
      %17 = vector.shape_cast %16 : vector<1x1x32xf32> to vector<1x32xf32>
      %18 = vector.broadcast %17 : vector<1x32xf32> to vector<2x32xf32>
      %19 = arith.addf %15, %18 : vector<2x32xf32>
      %c0_19 = arith.constant 0 : index
      %c0_20 = arith.constant 0 : index
      %c0_21 = arith.constant 0 : index
      %20 = vector.load %arg5[%c0_19, %c0_20, %c0_21] : memref<3x32x32xbf16, #tpu.memory_space<vmem>>, vector<1x32x32xbf16>
      %21 = vector.shape_cast %20 : vector<1x32x32xbf16> to vector<32x32xbf16>
      %cst_22 = arith.constant dense<0.000000e+00> : vector<2x32xf32>
      %22 = tpu.matmul %12, %21, %cst_22 {dimension_numbers = #tpu.dot_dimension_numbers<[1], [0], [0], [1], [0, 0, 1, 1], [], []>} : vector<2x32xbf16>, vector<32x32xbf16>, vector<2x32xf32> -> vector<2x32xf32>
      %c0_23 = arith.constant 0 : index
      %c0_24 = arith.constant 0 : index
      %c0_25 = arith.constant 0 : index
      %23 = vector.load %arg7[%c0_23, %c0_24, %c0_25] : memref<3x1x32xf32, #tpu.memory_space<vmem>>, vector<1x1x32xf32>
      %24 = vector.shape_cast %23 : vector<1x1x32xf32> to vector<1x32xf32>
      %25 = vector.broadcast %24 : vector<1x32xf32> to vector<2x32xf32>
      %26 = arith.addf %22, %25 : vector<2x32xf32>
      %c1 = arith.constant 1 : index
      %c0_26 = arith.constant 0 : index
      %c0_27 = arith.constant 0 : index
      %27 = vector.load %arg4[%c1, %c0_26, %c0_27] : memref<3x32x32xbf16, #tpu.memory_space<vmem>>, vector<1x32x32xbf16>
      %28 = vector.shape_cast %27 : vector<1x32x32xbf16> to vector<32x32xbf16>
      %cst_28 = arith.constant dense<0.000000e+00> : vector<2x32xf32>
      %29 = tpu.matmul %10, %28, %cst_28 {dimension_numbers = #tpu.dot_dimension_numbers<[1], [0], [0], [1], [0, 0, 1, 1], [], []>} : vector<2x32xbf16>, vector<32x32xbf16>, vector<2x32xf32> -> vector<2x32xf32>
      %c1_29 = arith.constant 1 : index
      %c0_30 = arith.constant 0 : index
      %c0_31 = arith.constant 0 : index
      %30 = vector.load %arg6[%c1_29, %c0_30, %c0_31] : memref<3x1x32xf32, #tpu.memory_space<vmem>>, vector<1x1x32xf32>
      %31 = vector.shape_cast %30 : vector<1x1x32xf32> to vector<1x32xf32>
      %32 = vector.broadcast %31 : vector<1x32xf32> to vector<2x32xf32>
      %33 = arith.addf %29, %32 : vector<2x32xf32>
      %c1_32 = arith.constant 1 : index
      %c0_33 = arith.constant 0 : index
      %c0_34 = arith.constant 0 : index
      %34 = vector.load %arg5[%c1_32, %c0_33, %c0_34] : memref<3x32x32xbf16, #tpu.memory_space<vmem>>, vector<1x32x32xbf16>
      %35 = vector.shape_cast %34 : vector<1x32x32xbf16> to vector<32x32xbf16>
      %cst_35 = arith.constant dense<0.000000e+00> : vector<2x32xf32>
      %36 = tpu.matmul %12, %35, %cst_35 {dimension_numbers = #tpu.dot_dimension_numbers<[1], [0], [0], [1], [0, 0, 1, 1], [], []>} : vector<2x32xbf16>, vector<32x32xbf16>, vector<2x32xf32> -> vector<2x32xf32>
      %c1_36 = arith.constant 1 : index
      %c0_37 = arith.constant 0 : index
      %c0_38 = arith.constant 0 : index
      %37 = vector.load %arg7[%c1_36, %c0_37, %c0_38] : memref<3x1x32xf32, #tpu.memory_space<vmem>>, vector<1x1x32xf32>
      %38 = vector.shape_cast %37 : vector<1x1x32xf32> to vector<1x32xf32>
      %39 = vector.broadcast %38 : vector<1x32xf32> to vector<2x32xf32>
      %40 = arith.addf %36, %39 : vector<2x32xf32>
      %c2 = arith.constant 2 : index
      %c0_39 = arith.constant 0 : index
      %c0_40 = arith.constant 0 : index
      %41 = vector.load %arg4[%c2, %c0_39, %c0_40] : memref<3x32x32xbf16, #tpu.memory_space<vmem>>, vector<1x32x32xbf16>
      %42 = vector.shape_cast %41 : vector<1x32x32xbf16> to vector<32x32xbf16>
      %cst_41 = arith.constant dense<0.000000e+00> : vector<2x32xf32>
      %43 = tpu.matmul %10, %42, %cst_41 {dimension_numbers = #tpu.dot_dimension_numbers<[1], [0], [0], [1], [0, 0, 1, 1], [], []>} : vector<2x32xbf16>, vector<32x32xbf16>, vector<2x32xf32> -> vector<2x32xf32>
      %c2_42 = arith.constant 2 : index
      %c0_43 = arith.constant 0 : index
      %c0_44 = arith.constant 0 : index
      %44 = vector.load %arg6[%c2_42, %c0_43, %c0_44] : memref<3x1x32xf32, #tpu.memory_space<vmem>>, vector<1x1x32xf32>
      %45 = vector.shape_cast %44 : vector<1x1x32xf32> to vector<1x32xf32>
      %46 = vector.broadcast %45 : vector<1x32xf32> to vector<2x32xf32>
      %47 = arith.addf %43, %46 : vector<2x32xf32>
      %c2_45 = arith.constant 2 : index
      %c0_46 = arith.constant 0 : index
      %c0_47 = arith.constant 0 : index
      %48 = vector.load %arg5[%c2_45, %c0_46, %c0_47] : memref<3x32x32xbf16, #tpu.memory_space<vmem>>, vector<1x32x32xbf16>
      %49 = vector.shape_cast %48 : vector<1x32x32xbf16> to vector<32x32xbf16>
      %cst_48 = arith.constant dense<0.000000e+00> : vector<2x32xf32>
      %50 = tpu.matmul %12, %49, %cst_48 {dimension_numbers = #tpu.dot_dimension_numbers<[1], [0], [0], [1], [0, 0, 1, 1], [], []>} : vector<2x32xbf16>, vector<32x32xbf16>, vector<2x32xf32> -> vector<2x32xf32>
      %c2_49 = arith.constant 2 : index
      %c0_50 = arith.constant 0 : index
      %c0_51 = arith.constant 0 : index
      %51 = vector.load %arg7[%c2_49, %c0_50, %c0_51] : memref<3x1x32xf32, #tpu.memory_space<vmem>>, vector<1x1x32xf32>
      %52 = vector.shape_cast %51 : vector<1x1x32xf32> to vector<1x32xf32>
      %53 = vector.broadcast %52 : vector<1x32xf32> to vector<2x32xf32>
      %54 = arith.addf %50, %53 : vector<2x32xf32>
      %55 = arith.addf %19, %26 : vector<2x32xf32>
      %56 = arith.negf %55 : vector<2x32xf32>
      %57 = math.exp %56 : vector<2x32xf32>
      %cst_52 = arith.constant 1.000000e+00 : f32
      %58 = vector.broadcast %cst_52 : f32 to vector<2x32xf32>
      %59 = arith.addf %58, %57 : vector<2x32xf32>
      %60 = arith.divf %58, %59 : vector<2x32xf32>
      %61 = arith.addf %33, %40 : vector<2x32xf32>
      %62 = arith.negf %61 : vector<2x32xf32>
      %63 = math.exp %62 : vector<2x32xf32>
      %cst_53 = arith.constant 1.000000e+00 : f32
      %64 = vector.broadcast %cst_53 : f32 to vector<2x32xf32>
      %65 = arith.addf %64, %63 : vector<2x32xf32>
      %66 = arith.divf %64, %65 : vector<2x32xf32>
      %67 = arith.mulf %60, %54 : vector<2x32xf32>
      %68 = arith.addf %47, %67 : vector<2x32xf32>
      %69 = math.tanh %68 : vector<2x32xf32>
      %cst_54 = arith.constant 1.000000e+00 : f32
      %70 = vector.broadcast %cst_54 : f32 to vector<2x32xf32>
      %71 = arith.subf %70, %66 : vector<2x32xf32>
      %72 = arith.mulf %71, %69 : vector<2x32xf32>
      %73 = arith.mulf %66, %11 : vector<2x32xf32>
      %74 = arith.addf %72, %73 : vector<2x32xf32>
      %c0_55 = arith.constant 0 : index
      %c0_56 = arith.constant 0 : index
      %75 = vector.load %arg13[%c0_55, %c0_56] : memref<2x32xf32, #tpu.memory_space<vmem>>, vector<2x32xf32>
      tpu.vector_store %arg13[%c0_55, %c0_56], %74 {strides = array<i32>} : memref<2x32xf32, #tpu.memory_space<vmem>>, vector<2x32xf32>,
      %c0_57 = arith.constant 0 : index
      %c0_58 = arith.constant 0 : index
      %c0_59 = arith.constant 0 : index
      %76 = vector.load %arg3[%c0_57, %c0_58, %c0_59] : memref<2x8x32xbf16, #tpu.memory_space<vmem>>, vector<2x8x32xbf16>
      %77 = arith.extf %76 : vector<2x8x32xbf16> to vector<2x8x32xf32>
      %78 = vector.shape_cast %74 : vector<2x32xf32> to vector<2x1x32xf32>
      %79 = vector.broadcast %78 : vector<2x1x32xf32> to vector<2x8x32xf32>
      %80 = arith.mulf %79, %77 : vector<2x8x32xf32>
      %cst_60 = arith.constant dense<0.000000e+00> : vector<2x8xf32>
      %81 = vector.multi_reduction <add>, %80, %cst_60 [2] : vector<2x8x32xf32> to vector<2x8xf32>
      %cst_61 = arith.constant dense<0xFF800000> : vector<2xf32>
      %82 = vector.multi_reduction <maximumf>, %81, %cst_61 [1] : vector<2x8xf32> to vector<2xf32>
      %83 = vector.shape_cast %82 : vector<2xf32> to vector<2x1xf32>
      %84 = vector.broadcast %83 : vector<2x1xf32> to vector<2x8xf32>
      %85 = arith.subf %81, %84 : vector<2x8xf32>
      %86 = math.exp %85 : vector<2x8xf32>
      %cst_62 = arith.constant dense<0.000000e+00> : vector<2xf32>
      %87 = vector.multi_reduction <add>, %86, %cst_62 [1] : vector<2x8xf32> to vector<2xf32>
      %88 = vector.shape_cast %87 : vector<2xf32> to vector<2x1xf32>
      %89 = vector.broadcast %88 : vector<2x1xf32> to vector<2x8xf32>
      %90 = arith.divf %86, %89 : vector<2x8xf32>
      %c0_63 = arith.constant 0 : index
      %c0_64 = arith.constant 0 : index
      %91 = vector.load %arg14[%c0_63, %c0_64] : memref<2x8xf32, #tpu.memory_space<vmem>>, vector<2x8xf32>
      tpu.vector_store %arg14[%c0_63, %c0_64], %90 {strides = array<i32>} : memref<2x8xf32, #tpu.memory_space<vmem>>, vector<2x8xf32>,
      %92 = vector.shape_cast %90 : vector<2x8xf32> to vector<2x8x1xf32>
      %93 = vector.broadcast %92 : vector<2x8x1xf32> to vector<2x8x32xf32>
      %94 = arith.mulf %93, %77 : vector<2x8x32xf32>
      %cst_65 = arith.constant dense<0.000000e+00> : vector<2x32xf32>
      %95 = vector.multi_reduction <add>, %94, %cst_65 [1] : vector<2x8x32xf32> to vector<2x32xf32>
      %96 = arith.truncf %74 : vector<2x32xf32> to vector<2x32xbf16>
      %c0_66 = arith.constant 0 : index
      %c0_67 = arith.constant 0 : index
      %c0_68 = arith.constant 0 : index
      %97 = vector.load %arg8[%c0_66, %c0_67, %c0_68] : memref<2x32x32xbf16, #tpu.memory_space<vmem>>, vector<1x32x32xbf16>
      %98 = vector.shape_cast %97 : vector<1x32x32xbf16> to vector<32x32xbf16>
      %cst_69 = arith.constant dense<0.000000e+00> : vector<2x32xf32>
      %99 = tpu.matmul %96, %98, %cst_69 {dimension_numbers = #tpu.dot_dimension_numbers<[1], [0], [0], [1], [0, 0, 1, 1], [], []>} : vector<2x32xbf16>, vector<32x32xbf16>, vector<2x32xf32> -> vector<2x32xf32>
      %100 = arith.truncf %95 : vector<2x32xf32> to vector<2x32xbf16>
      %c1_70 = arith.constant 1 : index
      %c0_71 = arith.constant 0 : index
      %c0_72 = arith.constant 0 : index
      %101 = vector.load %arg8[%c1_70, %c0_71, %c0_72] : memref<2x32x32xbf16, #tpu.memory_space<vmem>>, vector<1x32x32xbf16>
      %102 = vector.shape_cast %101 : vector<1x32x32xbf16> to vector<32x32xbf16>
      %cst_73 = arith.constant dense<0.000000e+00> : vector<2x32xf32>
      %103 = tpu.matmul %100, %102, %cst_73 {dimension_numbers = #tpu.dot_dimension_numbers<[1], [0], [0], [1], [0, 0, 1, 1], [], []>} : vector<2x32xbf16>, vector<32x32xbf16>, vector<2x32xf32> -> vector<2x32xf32>
      %104 = arith.addf %99, %103 : vector<2x32xf32>
      %c0_74 = arith.constant 0 : index
      %c0_75 = arith.constant 0 : index
      %105 = vector.load %arg9[%c0_74, %c0_75] : memref<1x32xf32, #tpu.memory_space<vmem>>, vector<1x32xf32>
      %106 = vector.broadcast %105 : vector<1x32xf32> to vector<2x32xf32>
      %107 = arith.addf %104, %106 : vector<2x32xf32>
      %108 = math.tanh %107 : vector<2x32xf32>
      %109 = arith.truncf %108 : vector<2x32xf32> to vector<2x32xbf16>
      %c0_76 = arith.constant 0 : index
      %c0_77 = arith.constant 0 : index
      %110 = vector.load %arg15[%c0_76, %c0_77] : memref<2x32xbf16, #tpu.memory_space<vmem>>, vector<2x32xbf16>
      tpu.vector_store %arg15[%c0_76, %c0_77], %109 {strides = array<i32>} : memref<2x32xbf16, #tpu.memory_space<vmem>>, vector<2x32xbf16>,
    } else {
    }
    %c0 = arith.constant 0 : index
    %c0_1 = arith.constant 0 : index
    %3 = vector.load %arg15[%c0, %c0_1] : memref<2x32xbf16, #tpu.memory_space<vmem>>, vector<2x32xbf16>
    %c0_2 = arith.constant 0 : index
    %c0_3 = arith.constant 0 : index
    %4 = vector.load %arg10[%c0_2, %c0_3] : memref<32x128xbf16, #tpu.memory_space<vmem>>, vector<32x128xbf16>
    %cst = arith.constant dense<0.000000e+00> : vector<2x128xf32>
    %5 = tpu.matmul %3, %4, %cst {dimension_numbers = #tpu.dot_dimension_numbers<[1], [0], [0], [1], [0, 0, 1, 1], [], []>} : vector<2x32xbf16>, vector<32x128xbf16>, vector<2x128xf32> -> vector<2x128xf32>
    %c0_4 = arith.constant 0 : index
    %c0_5 = arith.constant 0 : index
    %6 = vector.load %arg11[%c0_4, %c0_5] : memref<1x128xf32, #tpu.memory_space<vmem>>, vector<1x128xf32>
    %7 = vector.broadcast %6 : vector<1x128xf32> to vector<2x128xf32>
    %8 = arith.addf %5, %7 : vector<2x128xf32>
    %c0_6 = arith.constant 0 : index
    %c0_7 = arith.constant 0 : index
    %9 = vector.load %arg12[%c0_6, %c0_7] : memref<2x128xf32, #tpu.memory_space<vmem>>, vector<2x128xf32>
    tpu.vector_store %arg12[%c0_6, %c0_7], %8 {strides = array<i32>} : memref<2x128xf32, #tpu.memory_space<vmem>>, vector<2x128xf32>,
    return
  }
  func.func @transform_0(%arg0: i32) -> (i32, i32) {
    %c0_i32 = arith.constant 0 : i32
    %c0_i32_0 = arith.constant 0 : i32
    %c0_i32_1 = arith.constant 0 : i32
    return %c0_i32, %c0_i32_0 : i32, i32
  }
  func.func @transform_1(%arg0: i32) -> (i32, i32) {
    %c0_i32 = arith.constant 0 : i32
    %c0_i32_0 = arith.constant 0 : i32
    %c0_i32_1 = arith.constant 0 : i32
    return %c0_i32, %c0_i32_0 : i32, i32
  }
  func.func @transform_2(%arg0: i32) -> (i32, i32, i32) {
    %c0_i32 = arith.constant 0 : i32
    %c0_i32_0 = arith.constant 0 : i32
    %c0_i32_1 = arith.constant 0 : i32
    %c0_i32_2 = arith.constant 0 : i32
    return %c0_i32, %c0_i32_0, %c0_i32_1 : i32, i32, i32
  }
  func.func @transform_3(%arg0: i32) -> (i32, i32, i32) {
    %c0_i32 = arith.constant 0 : i32
    %c0_i32_0 = arith.constant 0 : i32
    %c0_i32_1 = arith.constant 0 : i32
    %c0_i32_2 = arith.constant 0 : i32
    return %c0_i32, %c0_i32_0, %c0_i32_1 : i32, i32, i32
  }
  func.func @transform_4(%arg0: i32) -> (i32, i32, i32) {
    %c0_i32 = arith.constant 0 : i32
    %c0_i32_0 = arith.constant 0 : i32
    %c0_i32_1 = arith.constant 0 : i32
    %c0_i32_2 = arith.constant 0 : i32
    return %c0_i32, %c0_i32_0, %c0_i32_1 : i32, i32, i32
  }
  func.func @transform_5(%arg0: i32) -> (i32, i32, i32) {
    %c0_i32 = arith.constant 0 : i32
    %c0_i32_0 = arith.constant 0 : i32
    %c0_i32_1 = arith.constant 0 : i32
    %c0_i32_2 = arith.constant 0 : i32
    return %c0_i32, %c0_i32_0, %c0_i32_1 : i32, i32, i32
  }
  func.func @transform_6(%arg0: i32) -> (i32, i32, i32) {
    %c0_i32 = arith.constant 0 : i32
    %c0_i32_0 = arith.constant 0 : i32
    %c0_i32_1 = arith.constant 0 : i32
    %c0_i32_2 = arith.constant 0 : i32
    return %c0_i32, %c0_i32_0, %c0_i32_1 : i32, i32, i32
  }
  func.func @transform_7(%arg0: i32) -> (i32, i32, i32) {
    %c0_i32 = arith.constant 0 : i32
    %c0_i32_0 = arith.constant 0 : i32
    %c0_i32_1 = arith.constant 0 : i32
    %c0_i32_2 = arith.constant 0 : i32
    return %c0_i32, %c0_i32_0, %c0_i32_1 : i32, i32, i32
  }
  func.func @transform_8(%arg0: i32) -> (i32, i32) {
    %c0_i32 = arith.constant 0 : i32
    %c0_i32_0 = arith.constant 0 : i32
    %c0_i32_1 = arith.constant 0 : i32
    return %c0_i32, %c0_i32_0 : i32, i32
  }
  func.func @transform_9(%arg0: i32) -> (i32, i32) {
    %c0_i32 = arith.constant 0 : i32
    %c0_i32_0 = arith.constant 0 : i32
    return %c0_i32, %arg0 : i32, i32
  }
  func.func @transform_10(%arg0: i32) -> (i32, i32) {
    %c0_i32 = arith.constant 0 : i32
    %c0_i32_0 = arith.constant 0 : i32
    return %c0_i32, %arg0 : i32, i32
  }
  func.func @transform_11(%arg0: i32) -> (i32, i32) {
    %c0_i32 = arith.constant 0 : i32
    %c0_i32_0 = arith.constant 0 : i32
    return %c0_i32, %arg0 : i32, i32
  }
  func.func @transform_12(%arg0: i32) -> (i32, i32) {
    %c0_i32 = arith.constant 0 : i32
    %c0_i32_0 = arith.constant 0 : i32
    %c0_i32_1 = arith.constant 0 : i32
    return %c0_i32, %c0_i32_0 : i32, i32
  }
  func.func @transform_13(%arg0: i32) -> (i32, i32) {
    %c0_i32 = arith.constant 0 : i32
    %c0_i32_0 = arith.constant 0 : i32
    %c0_i32_1 = arith.constant 0 : i32
    return %c0_i32, %c0_i32_0 : i32, i32
  }
}

</mosaic_0001>

<bundles_post_ra>
// kernel: luong_decoder_forward.1
= control target key start
LH: loop header
LB: loop body
LE: loop exit
PB: predicated region body
PF: predicated region fallthrough
CT: control target
= control target key end

     0   :  { %19 = vsyncpa [#allocation4], 0  ;;  %v1164_v1 = vmov 0.0   ;;  %vm1165_vm0 = vmmov 0   ;;  %vm74_vm1 = vcmask 261120   ;;  %s1454_s0 = inlined_call_operand.vmem [shape: bf16[2,32], index: 0, kind: input, shape index: {}]   ;;  %s1455_s1 = inlined_call_operand.vmem [shape: f32[2,32], index: 1, kind: input, shape index: {}]   ;;  %s1456_s2 = inlined_call_operand.vmem [shape: bf16[2,8,32], index: 2, kind: input, shape index: {}]   ;;  %s1457_s3 = inlined_call_operand.vmem [shape: bf16[3,32,32], index: 3, kind: input, shape index: {}]   ;;  %s1458_s4 = inlined_call_operand.vmem [shape: bf16[3,32,32], index: 4, kind: input, shape index: {}]   ;;  %s1459_s5 = inlined_call_operand.vmem [shape: f32[3,1,32], index: 5, kind: input, shape index: {}]   ;;  %s1460_s6 = inlined_call_operand.vmem [shape: f32[3,1,32], index: 6, kind: input, shape index: {}]   ;;  %s1461_s7 = inlined_call_operand.vmem [shape: bf16[2,32,32], index: 7, kind: input, shape index: {}]   ;;  %s1462_s8 = inlined_call_operand.vmem [shape: f32[1,32], index: 8, kind: input, shape index: {}]   ;;  %s1463_s9 = inlined_call_operand.vmem [shape: bf16[32,128], index: 9, kind: input, shape index: {}]   ;;  %s1464_s10 = inlined_call_operand.vmem [shape: f32[1,128], index: 10, kind: input, shape index: {}]   ;;  %s1465_s11 = inlined_call_operand.hbm [shape: f32[2,128], index: 11, kind: output, shape index: {0}]   ;;  %s1466_s12 = inlined_call_operand.hbm [shape: f32[2,32], index: 12, kind: output, shape index: {1}]   ;;  %s1467_s13 = inlined_call_operand.hbm [shape: f32[2,8], index: 13, kind: output, shape index: {2}]  }
   0x1   :  { %v1056_v0 = vld [vmem:[%s1457_s3] sm:$0xff]   ;;  %963 = vmatprep.subr.bf16.mxu0 %v1164_v1  ;;  %979 = vmatprep.subr.bf16.mxu1 %v1164_v1  ;;  %v1057_v2 = vld [vmem:[%s1457_s3 + $0x10] sm:$0xff]   ;;  %v1058_v3 = vld [vmem:[%s1457_s3 + $0x8] sm:$0xff]  }
   0x2   :  { %964 = vmatpush3.bf16.msra.mxu0 %v1056_v0  ;;  %967 = vmatprep.mubr.msk.bf16.mxu0 %vm1165_vm0, %v1164_v1  ;;  %v1059_v4 = vld [vmem:[%s1457_s3 + $0x18] sm:$0xff]   ;;  %v48_v5 = vld [vmem:[%s1454_s0] sm:$0x1]  ;;  %v1061_v7 = vld [vmem:[%s1458_s4 + $0x10] sm:$0xff]  }
   0x3   :  { %980 = vmatpush3.bf16.msra.mxu1 %v1057_v2  ;;  %965 = vmatprep.subr.bf16.mxu0 %v1164_v1  ;;  %v1060_v6 = vld [vmem:[%s1458_s4] sm:$0xff]   ;;  %v1062_v8 = vld [vmem:[%s1458_s4 + $0x8] sm:$0xff]   ;;  %v1063_v9 = vld [vmem:[%s1458_s4 + $0x18] sm:$0xff]  }
   0x4   :  { %981 = vmatprep.subr.bf16.mxu1 %v1164_v1  ;;  %983 = vmatprep.mubr.msk.bf16.mxu1 %vm1165_vm0, %v1164_v1  ;;  %v1289_v10 = vld [vmem:[%s1455_s1] sm:$0x3] }
   0x5   :  { %v50_v11 = vpack.c.bf16 %v1289_v10, %v1289_v10 }
   0x6   :  { %966 = vmatpush3.bf16.msra.mxu0 %v1058_v3 }
   0x7   :  { %982 = vmatpush3.bf16.msra.mxu1 %v1059_v4  ;;  %971 = vmatprep.subr.bf16.mxu0 %v1164_v1 }
   0x8   :  { %987 = vmatprep.subr.bf16.mxu1 %v1164_v1 }
   0x9   :  { %968 = vmatmul.mubr.msk.bf16.vlgmr.msra.gmra.mrb[0].mxu0 %vm74_vm1, %v48_v5 }
   0xa   :  { %984 = vmatmul.mubr.msk.bf16.vlgmr.msra.gmra.mrb[0].mxu1 %vm74_vm1, %v48_v5  ;;  %972 = vmatpush3.bf16.msra.mxu0 %v1060_v6 }
   0xb   :  { %988 = vmatpush3.bf16.msra.mxu1 %v1061_v7  ;;  %973 = vmatprep.subr.bf16.mxu0 %v1164_v1 }
   0xc   :  { %989 = vmatprep.subr.bf16.mxu1 %v1164_v1  ;;  %975 = vmatprep.mubr.msk.bf16.mxu0 %vm1165_vm0, %v1164_v1 }
   0xd   :  { %991 = vmatprep.mubr.msk.bf16.mxu1 %vm1165_vm0, %v1164_v1 }
   0xe   :  { %974 = vmatpush3.bf16.msra.mxu0 %v1062_v8 }
   0xf   :  { %990 = vmatpush3.bf16.msra.mxu1 %v1063_v9  ;;  %995 = vmatprep.subr.bf16.mxu0 %v1164_v1 }
  0x10   :  { %1003 = vmatprep.subr.bf16.mxu1 %v1164_v1 }
  0x11   :  { %20 = vsyncpa [#allocation6], 0  ;;  %v1065_v12 = vld [vmem:[%s1457_s3 + $0x20] sm:$0xff]   ;;  %v1067_v14 = vld [vmem:[%s1457_s3 + $0x28] sm:$0xff]   ;;  %v1166_v55 = vmov 1966171168   ;;  %v475_v57 = vlaneseq }
  0x12   :  { %v1064_v13 = vld [vmem:[%s1458_s4 + $0x20] sm:$0xff]   ;;  %v1066_v15 = vld [vmem:[%s1458_s4 + $0x28] sm:$0xff]   ;;  %v473_v56 = vunpack.c.l.s4 %v1166_v55  ;;  %vm465_vm2 = vcmask 254976   ;;  %vm524_vm3 = vcmask 1041409   ;;  %vm527_vm4 = vcmask 58368   ;;  %v1070_v55 = vld [vmem:[%s1461_s7 + $0x10] sm:$0xff]  }
  0x13   :  { %v1068_v16 = vld [vmem:[%s1461_s7] sm:$0xff]   ;;  %v1069_v17 = vld [vmem:[%s1461_s7 + $0x8] sm:$0xff]   ;;  %v1348_v60 = vshrl.u32 %v475_v57, 7  ;;  %vm759_vm5 = vcmask 253952  }
  0x14   :  { %v871_v18 = vld [vmem:[%s1459_s5] ss:$0 sm:$0xff]  ;;  %v884_v21 = vld [vmem:[%s1459_s5 + $0x1] ss:$0 sm:$0xff]  ;;  %v911_v47 = vld [vmem:[%s1460_s6 + $0x2] ss:$0 sm:$0xff]  ;;  %v474_v59 = vunpack.c.0.s8 %v473_v56 }
  0x15   :  { %976 = vmatmul.mubr.msk.bf16.vlgmr.msra.gmra.mrb[0].mxu0 %vm74_vm1, %v50_v11  ;;  %v875_v19 = vld [vmem:[%s1460_s6] ss:$0 sm:$0xff]  ;;  %v893_v22 = vld [vmem:[%s1460_s6 + $0x1] ss:$0 sm:$0xff]  ;;  %v902_v48 = vld [vmem:[%s1459_s5 + $0x2] ss:$0 sm:$0xff] }
  0x16   :  { %992 = vmatmul.mubr.msk.bf16.vlgmr.msra.gmra.mrb[0].mxu1 %vm74_vm1, %v50_v11  ;;  %996 = vmatpush3.bf16.msra.mxu0 %v1065_v12  ;;  %v1035_v20 = vadd.f32 %v875_v19, %v871_v18  ;;  %v1037_v24 = vadd.f32 %v893_v22, %v884_v21  ;;  %v477_v2 = vsub.s32 %v474_v59, %v1348_v60  ;;  %v1355_v4 = vld [vmem:[%s1456_s2] sm:$0xff]   ;;  %v496_v7 = vsub.s32 0, %v1348_v60  ;;  %v1071_v56 = vld [vmem:[%s1461_s7 + $0x18] sm:$0xff]  }
  0x17   :  { %1004 = vmatpush3.bf16.msra.mxu1 %v1064_v13  ;;  %997 = vmatprep.subr.bf16.mxu0 %v1164_v1  ;;  %v934_v8 = vunpack.c.l.bf16 %v1355_v4  ;;  %v935_v12 = vunpack.c.h.bf16 %v1355_v4  ;;  %v515_v19 = vand.u32 127, %v475_v57 }
  0x18   :  { %1005 = vmatprep.subr.bf16.mxu1 %v1164_v1  ;;  %1007 = vmatprep.mubr.msk.bf16.mxu1 %vm1165_vm0, %v1164_v1 }
  0x19   :  { %999 = vmatprep.mubr.msk.bf16.mxu0 %vm1165_vm0, %v1164_v1  ;;  %v1368_v21 = vsub.s32 %v515_v19, %v1348_v60 }
  0x1a   :  { %998 = vmatpush3.bf16.msra.mxu0 %v1067_v14 }
  0x1b   :  { %1006 = vmatpush3.bf16.msra.mxu1 %v1066_v15  ;;  %1011 = vmatprep.subr.bf16.mxu0 %v1164_v1 }
  0x1c   :  { %1019 = vmatprep.subr.bf16.mxu1 %v1164_v1 }
  0x1d   :  { %1000 = vmatmul.mubr.msk.bf16.vlgmr.msra.gmra.mrb[4].mxu0 %vm74_vm1, %v48_v5 }
  0x1e   :  { %1008 = vmatmul.mubr.msk.bf16.vlgmr.msra.gmra.mrb[4].mxu1 %vm74_vm1, %v50_v11  ;;  %1015 = vmatprep.mubr.msk.bf16.mxu0 %vm1165_vm0, %v1164_v1 }
  0x1f   :  { %1023 = vmatprep.mubr.msk.bf16.mxu1 %vm1165_vm0, %v1164_v1  ;;  %1020 = vmatpush3.bf16.msra.mxu1 %v1068_v16 }
  0x20   :  { %1021 = vmatprep.subr.bf16.mxu1 %v1164_v1  ;;  %1012 = vmatpush3.bf16.msra.mxu0 %v1070_v55 }
  0x21   :  { %1013 = vmatprep.subr.bf16.mxu0 %v1164_v1 }
  0x23   :  { %1022 = vmatpush3.bf16.msra.mxu1 %v1069_v17 }
  0x24   :  { %1014 = vmatpush3.bf16.msra.mxu0 %v1071_v56 }
  0x25   :  { %1027 = vmatprep.subr.bf16.mxu0 %v1164_v1 }
  0xe8   :  { %v178_v23 = vpop.f32.mrb[0].mxu0 }
  0xe9   :  { %v1036_v25 = vadd.f32 %v1035_v20, %v178_v23  ;;  %v308_v26 = vpop.f32.mrb[0].mxu1  ;;  %v977_v27 = vpop.f32.mrb[1].mxu0 }
  0xea   :  { %v993_v28 = vpop.f32.mrb[1].mxu1  ;;  %v181_v29 = vpop.f32.mrb[2].mxu0  ;;  %v1038_v33 = vadd.f32 %v1037_v24, %v308_v26  ;;  %v1167_v27 = vmov 0  }
  0xeb   :  { %v915_v30 = vmul.f32 -1.442695, %v1036_v25  ;;  %v311_v31 = vpop.f32.mrb[2].mxu1  ;;  %v978_v32 = vpop.f32.mrb[3].mxu0  ;;  %1055 = vset.pattern.permute.xlu0 %v1167_v27  ;;  %1054 = vset.pattern.permute.xlu1 %v1167_v27 }
  0xec   :  { %v994_v34 = vpop.f32.mrb[3].mxu1  ;;  %v916_v35 = vmul.f32 -1.442695, %v1038_v33  ;;  %v538_v32 = vsub.s32 1, %v1348_v60 }
  0xed   :  { %1074 = vpow2.f32 %v915_v30 }
  0xee   :  { %1076 = vpow2.f32 %v916_v35 }
  0xf0   :  { %v373_v36 = vpop.f32.mrb[4].mxu0 }
  0xf1   :  { %v438_v37 = vpop.f32.mrb[4].mxu1  ;;  %v1001_v38 = vpop.f32.mrb[5].mxu0  ;;  %v374_v51 = vadd.f32 %v902_v48, %v373_v36 }
  0xf2   :  { %v1009_v39 = vpop.f32.mrb[5].mxu1  ;;  %v376_v40 = vpop.f32.mrb[6].mxu0  ;;  %v439_v50 = vadd.f32 %v911_v47, %v438_v37 }
  0xf3   :  { %v441_v41 = vpop.f32.mrb[6].mxu1  ;;  %v1002_v42 = vpop.f32.mrb[7].mxu0 }
  0xf4   :  { %v1010_v43 = vpop.f32.mrb[7].mxu1 }
  0xf7   :  { %v1075_v44 = vpop.eup %1074 }
  0xf8   :  { %v448_v45 = vadd.f32 1.0, %v1075_v44  ;;  %v1077_v46 = vpop.eup %1076 }
  0xf9   :  { %v455_v49 = vadd.f32 1.0, %v1077_v46 }
  0xfa   :  { %1078 = vrcp.f32 %v448_v45 }
  0xfb   :  { %1080 = vrcp.f32 %v455_v49 }
 0x104   :  { %v1079_v52 = vpop.eup %1078 }
 0x105   :  { %v458_v53 = vmul.f32 %v1079_v52, %v439_v50  ;;  %v1081_v58 = vpop.eup %1080 }
 0x106   :  { %v461_v61 = vsub.f32 1.0, %v1081_v58  ;;  %v463_v63 = vmul.f32 %v1081_v58, %v1289_v10 }
 0x107   :  { %v459_v54 = vadd.f32 %v458_v53, %v374_v51 }
 0x109   :  { %1082 = vtanh.f32 %v459_v54 }
 0x113   :  { %v1083_v62 = vpop.eup %1082 }
 0x114   :  { %v462_v0 = vmul.f32 %v1083_v62, %v461_v61 }
 0x116   :  { %v464_v3 = vadd.f32 %v463_v63, %v462_v0 }
 0x118   :  { %v621_v5 = vpack.c.bf16 %v464_v3, %v464_v3  ;;  %v478_v6 = vrot.slane %v464_v3, %v477_v2  ;;  %466 = vst.msk [vmem:[#allocation5] sm:$0x3] %vm465_vm2, %v464_v3 }
 0x11a   :  { %1024 = vmatmul.mubr.msk.bf16.vlgmr.msra.gmra.mrb[8].mxu1 %vm74_vm1, %v621_v5  ;;  %v486_v9 = vrot.slane %v478_v6, %v477_v2  ;;  %v479_v10 = vcombine.high %v478_v6, %v478_v6 }
 0x11c   :  { %v497_v11 = vrot.slane %v486_v9, %v496_v7  ;;  %v493_v13 = vrot.slane %v479_v10, %v477_v2 }
 0x11e   :  { %v504_v14 = vmul.f32 %v934_v8, %v497_v11  ;;  %v501_v15 = vrot.slane %v493_v13, %v496_v7 }
 0x120   :  { %v506_v16 = vsel %vm74_vm1, %v504_v14, 0.0  ;;  %v505_v17 = vmul.f32 %v935_v12, %v501_v15 }
 0x121   :  { %507 = vadd.xlane.f32.xlu0 %v506_v16 }
 0x122   :  { %v509_v18 = vsel %vm74_vm1, %v505_v17, 0.0 }
 0x125   :  { %510 = vadd.xlane.f32.xlu0 %v509_v18 }
 0x1ae   :  { %v508_v20 = vpop.xlane.xlu0 %507 }
 0x1af   :  { %v519_v23 = vrot.slane %v508_v20, %v1368_v21 }
 0x1b2   :  { %v511_v22 = vpop.xlane.xlu0 %510 }
 0x1b3   :  { %v523_v24 = vrot.slane %v511_v22, %v1368_v21 }
 0x1b5   :  { %v525_v25 = vsel %vm524_vm3, %v523_v24, %v519_v23  ;;  %v927_v24 = vld [vmem:[%s1462_s8] ss:$0 sm:$0xff] }
 0x1b6   :  { %v528_v26 = vsel %vm527_vm4, %v525_v25, -inf }
 0x1b7   :  { %529 = vmax.xlane.f32.xlu1 %v528_v26 }
 0x1ed   :  { %v1374_v28 = vpop.f32.mrb[8].mxu1 }
 0x1ee   :  { %v1025_v29 = vpop.f32.mrb[9].mxu1 }
 0x1ef   :  { %v746_v30 = vpop.f32.mrb[10].mxu1 }
 0x1f0   :  { %v1026_v31 = vpop.f32.mrb[11].mxu1 }
 0x244   :  { %v530_v33 = vpop.xlane.xlu1 %529 }
 0x245   :  { %v535_v34 = vrot.slane %v530_v33, %v496_v7  ;;  %v539_v35 = vrot.slane %v530_v33, %v538_v32 }
 0x247   :  { %v542_v36 = vsub.f32 %v508_v20, %v535_v34  ;;  %v543_v37 = vsub.f32 %v511_v22, %v539_v35  ;;  %v1073_v22 = vld [vmem:[%s1463_s9 + $0x8] sm:$0xff]  }
 0x249   :  { %v544_v38 = vmul.f32 1.442695, %v542_v36  ;;  %v546_v39 = vmul.f32 1.442695, %v543_v37 }
 0x24b   :  { %1084 = vpow2.f32 %v544_v38 }
 0x24c   :  { %1086 = vpow2.f32 %v546_v39 }
 0x255   :  { %v1085_v40 = vpop.eup %1084 }
 0x256   :  { %v1087_v41 = vpop.eup %1086  ;;  %551 = vperm.xlu1 %1054, %v1085_v40  }
 0x257   :  { %554 = vperm.xlu0 %1055, %v1087_v41  }
 0x2d5   :  { %v552_v42 = vpop.permute.xlu1 %551 }
 0x2d6   :  { %v555_v43 = vpop.permute.xlu0 %554  ;;  %v559_v44 = vrot.slane %v552_v42, %v1368_v21 }
 0x2d7   :  { %v563_v45 = vrot.slane %v555_v43, %v1368_v21 }
 0x2d9   :  { %v564_v46 = vsel %vm524_vm3, %v563_v45, %v559_v44 }
 0x2da   :  { %v566_v47 = vsel %vm527_vm4, %v564_v46, 0.0 }
 0x2db   :  { %567 = vadd.xlane.f32.xlu1 %v566_v47 }
 0x368   :  { %v568_v48 = vpop.xlane.xlu1 %567 }
 0x369   :  { %v573_v49 = vrot.slane %v568_v48, %v496_v7  ;;  %v577_v50 = vrot.slane %v568_v48, %v538_v32 }
 0x36b   :  { %1088 = vrcp.f32 %v573_v49 }
 0x36c   :  { %1090 = vrcp.f32 %v577_v50 }
 0x375   :  { %v1089_v51 = vpop.eup %1088 }
 0x376   :  { %v581_v52 = vmul.f32 %v1089_v51, %v1085_v40  ;;  %v1091_v53 = vpop.eup %1090 }
 0x377   :  { %v583_v54 = vmul.f32 %v1091_v53, %v1087_v41 }
 0x378   :  { %587 = vperm.xlu0 %1055, %v581_v52  }
 0x37c   :  { %590 = vperm.xlu0 %1055, %v583_v54  }
 0x3f7   :  { %v588_v57 = vpop.permute.xlu0 %587 }
 0x3f8   :  { %v605_v58 = vmul.f32 %v934_v8, %v588_v57  ;;  %v595_v62 = vrot.slane %v588_v57, %v1368_v21 }
 0x3fa   :  { %v607_v59 = vsel %vm74_vm1, %v605_v58, 0.0 }
 0x3fb   :  { %v608_v60 = vrot.slane %v607_v59, 4  ;;  %v591_v61 = vpop.permute.xlu0 %590 }
 0x3fc   :  { %v599_v63 = vrot.slane %v591_v61, %v1368_v21  ;;  %v606_v0 = vmul.f32 %v935_v12, %v591_v61  ;;  %v1072_v21 = vld [vmem:[%s1463_s9] sm:$0xff]   ;;  %s1168_s9 = smov [#allocation5]  }
 0x3fd   :  { %v609_v2 = vadd.f32 %v608_v60, %v607_v59  ;;  %s846_s18 = sshll.u32 %s1168_s9, 4  ;;  %s847_s18 = int_to_ptr.vmem [resolvable:$true] %s846_s18 }
 0x3fe   :  { %v614_v3 = vsel %vm74_vm1, %v606_v0, 0.0  ;;  %v600_v5 = vsel %vm524_vm3, %v599_v63, %v595_v62  ;;  %s1094_s19 = scalar_lea.vmem %s847_s18, 32  ;;  %p1099_p1 = scmp.lt.s32.totalorder %s847_s18, %s847_s18 }
 0x3ff   :  { %v610_v6 = vrot.slane %v609_v2, 2  ;;  %v615_v7 = vrot.slane %v614_v3, 4  ;;  %602 = vst.msk [vmem:[#allocation7] sm:$0x3] %vm527_vm4, %v600_v5  ;;  %p1095_p0 = scmp.ne.s32.totalorder %s847_s18, %s1094_s19  ;;  %p1100_p2 = scmp.lt.s32.totalorder %s1094_s19, %s1094_s19 }
 0x401   :  { %v611_v8 = vadd.f32 %v610_v6, %v609_v2  ;;  %v616_v9 = vadd.f32 %v615_v7, %v614_v3  ;;  %p1101_p3 = por %p1100_p2, %p1099_p1 }
 0x403   :  { %v612_v10 = vrot.slane %v611_v8, 1  ;;  %v617_v11 = vrot.slane %v616_v9, 2  ;;  %p1102_p4 = pnand %p1101_p3, %p1095_p0 }
 0x405   :  { %v613_v13 = vadd.f32 %v612_v10, %v611_v8  ;;  %v618_v14 = vadd.f32 %v617_v11, %v616_v9 }
 0x407   :  { %v619_v15 = vrot.slane %v618_v14, 1  ;;  %v626_v16 = vpack.c.bf16 %v613_v13, %v613_v13 }
 0x409   :  { %v620_v17 = vadd.f32 %v619_v15, %v618_v14  ;;  %v635_v12 = vunpack.c.l.b16 %v626_v16 }
 0x40b   :  { %v627_v4 = vpack.c.bf16 %v620_v17, %v620_v17 }
 0x40d   :  { %v636_v18 = vunpack.c.l.b16 %v627_v4 }
 0x40f   :  { %v637_v19 = vsel %vm524_vm3, %v636_v18, %v635_v12 }
 0x410   :  { %v638_v20 = vpack.c.b16 %v637_v19, %v637_v19 }
 0x412   :  { %1016 = vmatmul.mubr.msk.bf16.vlgmr.msra.gmra.mrb[8].mxu0 %vm74_vm1, %v638_v20 }
 0x413   :  { %1031 = vmatprep.mubr.msk.bf16.mxu0 %vm1165_vm0, %v1164_v1  ;;  %1028 = vmatpush3.bf16.msra.mxu0 %v1072_v21 }
 0x414   :  { %1029 = vmatprep.subr.bf16.mxu0 %v1164_v1 }
 0x417   :  { %1030 = vmatpush3.bf16.msra.mxu0 %v1073_v22 }
 0x4e5   :  { %v688_v23 = vpop.f32.mrb[8].mxu0 }
 0x4e6   :  { %v744_v25 = vadd.f32 %v1374_v28, %v688_v23  ;;  %v1017_v26 = vpop.f32.mrb[9].mxu0 }
 0x4e7   :  { %v691_v27 = vpop.f32.mrb[10].mxu0 }
 0x4e8   :  { %v756_v29 = vadd.f32 %v927_v24, %v744_v25  ;;  %v1018_v30 = vpop.f32.mrb[11].mxu0 }
 0x4ea   :  { %1092 = vtanh.f32 %v756_v29 }
 0x4f4   :  { %v1093_v31 = vpop.eup %1092 }
 0x4f5   :  { %v758_v32 = vpack.c.bf16 %v1093_v31, %v1093_v31 }
 0x4f7   :  { %760 = vst.msk [vmem:[#allocation2] sm:$0x1] %vm759_vm5, %v758_v32 }
 0x4fe   :  { %v761_v33 = vld [vmem:[#allocation2] sm:$0x1] }
 0x4ff   :  { %1032 = vmatmul.mubr.msk.bf16.vlgmr.msra.gmra.mrb[12].mxu0 %vm74_vm1, %v761_v33 }
 0x500   :  { %1105 = shalt.err (!%p1102_p4)
}
 0x501   :  { %s1106_s21 = scalar_lea.hbm %s1466_s12, 32 }
 0x502   :  { %p1107_p5 = scmp.ne.s32.totalorder %s1466_s12, %s1106_s21  ;;  %p1110_p6 = scmp.lt.u32.totalorder %s1106_s21, %s1466_s12 }
 0x504   :  { %p1112_p7 = pnand %p1110_p6, %p1107_p5 }
 0x506   :  { %1115 = shalt.err (!%p1112_p7)
}
 0x507   :  { %849 = dma.vmem_to_hbm [thread:$0]  %s847_s18, 32, %s1466_s12, [#allocation6]  }
 0x508   :  { %s1169_s27 = smov [#allocation7]  }
 0x509   :  { %s856_s28 = sshll.u32 %s1169_s27, 4  ;;  %s857_s28 = int_to_ptr.vmem [resolvable:$true] %s856_s28 }
 0x50a   :  { %s1116_s29 = scalar_lea.vmem %s857_s28, 32  ;;  %p1121_p9 = scmp.lt.s32.totalorder %s857_s28, %s857_s28 }
 0x50b   :  { %p1117_p8 = scmp.ne.s32.totalorder %s857_s28, %s1116_s29  ;;  %p1122_p10 = scmp.lt.s32.totalorder %s1116_s29, %s1116_s29 }
 0x50d   :  { %p1123_p11 = por %p1122_p10, %p1121_p9 }
 0x50f   :  { %p1124_p12 = pnand %p1123_p11, %p1117_p8 }
 0x511   :  { %1127 = shalt.err (!%p1124_p12)
}
 0x512   :  { %s1128_s2 = scalar_lea.hbm %s1467_s13, 32 }
 0x513   :  { %p1129_p13 = scmp.ne.s32.totalorder %s1467_s13, %s1128_s2  ;;  %p1132_p0 = scmp.lt.u32.totalorder %s1128_s2, %s1467_s13 }
 0x515   :  { %p1134_p1 = pnand %p1132_p0, %p1129_p13 }
 0x517   :  { %1137 = shalt.err (!%p1134_p1)
}
 0x518   :  { %859 = dma.vmem_to_hbm [thread:$0]  %s857_s28, 32, %s1467_s13, [#allocation6]   ;;  %v928_v1 = vld [vmem:[%s1464_s10] ss:$0 sm:$0xff] }
 0x519   :  { %s1170_s4 = smov [#allocation3]  }
 0x51a   :  { %s836_s17 = sshll.u32 %s1170_s4, 4  ;;  %s837_s17 = int_to_ptr.vmem [resolvable:$true] %s836_s17 }
 0x51b   :  { %s1138_s9 = scalar_lea.vmem %s837_s17, 32  ;;  %p1143_p3 = scmp.lt.s32.totalorder %s837_s17, %s837_s17 }
 0x51c   :  { %p1139_p2 = scmp.ne.s32.totalorder %s837_s17, %s1138_s9  ;;  %p1144_p4 = scmp.lt.s32.totalorder %s1138_s9, %s1138_s9 }
 0x51e   :  { %p1145_p5 = por %p1144_p4, %p1143_p3 }
 0x520   :  { %p1146_p6 = pnand %p1145_p5, %p1139_p2 }
 0x5d2   :  { %v823_v28 = vpop.f32.mrb[12].mxu0 }
 0x5d3   :  { %v824_v34 = vadd.f32 %v928_v1, %v823_v28  ;;  %v1033_v35 = vpop.f32.mrb[13].mxu0 }
 0x5d4   :  { %v826_v36 = vpop.f32.mrb[14].mxu0 }
 0x5d5   :  { %829 = vst [vmem:[#allocation3] sm:$0x3] %v824_v34  ;;  %v1034_v37 = vpop.f32.mrb[15].mxu0 }
 0x5d6   :  { %1149 = shalt.err (!%p1146_p6)
}
 0x5d7   :  { %s1150_s10 = scalar_lea.hbm %s1465_s11, 32 }
 0x5d8   :  { %p1151_p7 = scmp.ne.s32.totalorder %s1465_s11, %s1150_s10  ;;  %p1154_p8 = scmp.lt.u32.totalorder %s1150_s10, %s1465_s11 }
 0x5da   :  { %p1156_p9 = pnand %p1154_p8, %p1151_p7 }
 0x5dc   :  { %1159 = shalt.err (!%p1156_p9)
}
 0x5dd   :  { %839 = dma.vmem_to_hbm [thread:$0]  %s837_s17, 32, %s1465_s11, [#allocation4]  }
 0x5de   :  { %1160 = dma.done.wait [#allocation4], 32  }
 0x5df   :  { %1161 = vsyncadd [#allocation4], 4294967264 }
 0x5e0   :  { %1162 = dma.done.wait [#allocation6], 64  }
 0x5e1   :  { %1163 = vsyncadd [#allocation6], 4294967232 }
 0x5e2   :  { %869 = vsyncpa [#allocation4], 1 }
 0x5e3   :  { %870 = vsyncpa [#allocation6], 1 }

</bundles_post_ra>
